<compile_context>
chip_gen: v7x
topology: tpu7x:2x2x1
jax: 0.10.0
libtpu: 0.0.40
codegen_flags: <defaults>
</compile_context>

<pallas_src>
import functools

import jax
import jax.numpy as jnp
from jax import lax
from jax.experimental import pallas as pl
from jax.experimental.pallas import tpu as pltpu

_LANES = 128
_ACC_ROWS = 64                          # 8 independent (8,128) f32 partials
_TARGET_BLOCK_BYTES = 2 * 1024 * 1024   # per-input, per-buffer tile size
_VMEM_LIMIT_BYTES = 32 * 1024 * 1024


def _content_loss_kernel(x_ref, t_ref, o_ref, *, block_rows, acc_rows,
                         total_rows, ragged):
    """Accumulate partial sums of (x - t)^2 into a resident (acc_rows, 128) block."""
    k = pl.program_id(0)

    @pl.when(k == 0)
    def _init():
        o_ref[...] = jnp.zeros_like(o_ref)

    d = x_ref[...].astype(jnp.float32) - t_ref[...].astype(jnp.float32)
    sq = d * d

    def _accum(vals):
        # Reduce only down to (acc_rows, 128): 8 independent (8,128) add
        # chains (VPU only, no XLU), folded to a scalar in the wrapper.
        o_ref[...] += vals.reshape(-1, acc_rows, _LANES).sum(axis=0)

    if ragged:
        last = pl.num_programs(0) - 1

        @pl.when(k != last)
        def _full_block():
            _accum(sq)

        @pl.when(k == last)
        def _ragged_block():
            # Mask rows past the true row count (covers the partial boundary
            # block; out-of-bounds VMEM contents are zeroed before the add).
            rows = k * block_rows + lax.broadcasted_iota(
                jnp.int32, (block_rows, _LANES), 0)
            _accum(jnp.where(rows < total_rows, sq, 0.0))
    else:
        _accum(sq)


def _pick_tiling(n_rows, itemsize):
    """Choose (block_rows, acc_rows): dtype-aware ~2 MiB blocks, 64-row multiples."""
    target_rows = max(
        _ACC_ROWS,
        (_TARGET_BLOCK_BYTES // (_LANES * itemsize)) // _ACC_ROWS * _ACC_ROWS)
    if n_rows >= target_rows:
        return target_rows, _ACC_ROWS
    if n_rows >= _ACC_ROWS:
        return (n_rows // _ACC_ROWS) * _ACC_ROWS, _ACC_ROWS
    # Tiny input: one block spanning the full row extent (always a legal block).
    return n_rows, n_rows


def content_loss(x, target, weight):
    """weight * mean((x - target)^2), matching nn.MSELoss (mean reduction)."""
    assert x.shape == target.shape, "x and target must have identical shapes"
    n_elems = x.size

    xf = x.reshape(-1)
    tf = target.reshape(-1)

    n_main = (n_elems // _LANES) * _LANES
    tail_sum = 0.0
    if n_main != n_elems:
        # <128-element remainder: sum its squared diff in plain JAX (tiny).
        # (Slicing the aligned prefix may materialize a copy; typical CNN
        # activation sizes are multiples of 128 so this path is rarely taken.)
        dt = xf[n_main:].astype(jnp.float32) - tf[n_main:].astype(jnp.float32)
        tail_sum = jnp.sum(dt * dt)
        xf = xf[:n_main]
        tf = tf[:n_main]

    if n_main == 0:
        return (weight / n_elems) * tail_sum

    x2d = xf.reshape(-1, _LANES)   # layout-preserving (free) reshape
    t2d = tf.reshape(-1, _LANES)
    n_rows = x2d.shape[0]

    itemsize = max(jnp.dtype(x.dtype).itemsize, jnp.dtype(target.dtype).itemsize)
    block_rows, acc_rows = _pick_tiling(n_rows, itemsize)
    n_blocks = pl.cdiv(n_rows, block_rows)
    ragged = (n_rows % block_rows) != 0

    kernel = functools.partial(
        _content_loss_kernel,
        block_rows=block_rows,
        acc_rows=acc_rows,
        total_rows=n_rows,
        ragged=ragged,
    )

    partials = pl.pallas_call(
        kernel,
        out_shape=jax.ShapeDtypeStruct((acc_rows, _LANES), jnp.float32),
        grid_spec=pltpu.PrefetchScalarGridSpec(
            num_scalar_prefetch=0,
            grid=(n_blocks,),
            in_specs=[
                pl.BlockSpec((block_rows, _LANES), lambda k: (k, 0)),
                pl.BlockSpec((block_rows, _LANES), lambda k: (k, 0)),
            ],
            out_specs=pl.BlockSpec((acc_rows, _LANES), lambda k: (0, 0)),
        ),
        compiler_params=pltpu.CompilerParams(
            dimension_semantics=("arbitrary",),
            vmem_limit_bytes=_VMEM_LIMIT_BYTES,
        ),
    )(x2d, t2d)

    # Final tiny reduce + (weight / num_elements) scaling outside the kernel.
    return (weight / n_elems) * (jnp.sum(partials) + tail_sum)


if __name__ == "__main__":
    key = jax.random.PRNGKey(0)

    def run_case(k, shape, dtype=jnp.float32, weight=0.5):
        kx, kt = jax.random.split(k)
        x = jax.random.normal(kx, shape, dtype=dtype)
        t = jax.random.normal(kt, shape, dtype=dtype)
        loss = jax.block_until_ready(content_loss(x, t, weight))
        ref = weight * jnp.mean(
            (x.astype(jnp.float32) - t.astype(jnp.float32)) ** 2)
        assert jnp.allclose(loss, ref, rtol=1e-4, atol=1e-5), (shape, loss, ref)

    k0, k1, k2 = jax.random.split(key, 3)
    # Small NCHW feature map consistent with CNN activations (single block).
    run_case(k0, (2, 4, 16, 16))
    # Multi-block with a ragged last block (exercises the tail-block mask).
    run_case(k1, (2, 8, 17, 96))
    # Lane-unaligned element count (<128-element tail handled in the wrapper).
    run_case(k2, (5, 417))

    print("KERNEL_OK")
</pallas_src>

<mosaic_0001>
module attributes {stable_mosaic.version = 11 : i64} {
  func.func @_content_loss_kernel(%arg0: i32, %arg1: memref<16x128xf32, #tpu.memory_space<vmem>>, %arg2: memref<16x128xf32, #tpu.memory_space<vmem>>, %arg3: memref<16x128xf32, #tpu.memory_space<vmem>>) attributes {dimension_semantics = [#tpu.dimension_semantics<arbitrary>], iteration_bounds = array<i64: 1>, scalar_prefetch = 0 : i64, scratch_operands = 0 : i64, tpu.core_type = #tpu.core_type<tc>, window_params = [{transform_indices = @transform_0, window_bounds = array<i64: 16, 128>}, {transform_indices = @transform_1, window_bounds = array<i64: 16, 128>}, {pipeline_mode = #tpu.pipeline_mode<synchronous>, transform_indices = @transform_2, window_bounds = array<i64: 16, 128>}]} {
    %c0_i32 = arith.constant 0 : i32
    %0 = arith.cmpi eq, %arg0, %c0_i32 : i32
    %1 = arith.extui %0 : i1 to i32
    %c0_i32_0 = arith.constant 0 : i32
    %2 = arith.cmpi ne, %1, %c0_i32_0 : i32
    scf.if %2 {
      %cst_8 = arith.constant 0.000000e+00 : f32
      %12 = vector.broadcast %cst_8 : f32 to vector<16x128xf32>
      %c0_9 = arith.constant 0 : index
      %c0_10 = arith.constant 0 : index
      %13 = vector.load %arg3[%c0_9, %c0_10] : memref<16x128xf32, #tpu.memory_space<vmem>>, vector<16x128xf32>
      tpu.vector_store %arg3[%c0_9, %c0_10], %12 {strides = array<i32>} : memref<16x128xf32, #tpu.memory_space<vmem>>, vector<16x128xf32>,
    } else {
    }
    %c0 = arith.constant 0 : index
    %c0_1 = arith.constant 0 : index
    %3 = vector.load %arg1[%c0, %c0_1] : memref<16x128xf32, #tpu.memory_space<vmem>>, vector<16x128xf32>
    %c0_2 = arith.constant 0 : index
    %c0_3 = arith.constant 0 : index
    %4 = vector.load %arg2[%c0_2, %c0_3] : memref<16x128xf32, #tpu.memory_space<vmem>>, vector<16x128xf32>
    %5 = arith.subf %3, %4 : vector<16x128xf32>
    %6 = arith.mulf %5, %5 : vector<16x128xf32>
    %c0_4 = arith.constant 0 : index
    %c0_5 = arith.constant 0 : index
    %7 = vector.load %arg3[%c0_4, %c0_5] : memref<16x128xf32, #tpu.memory_space<vmem>>, vector<16x128xf32>
    %8 = vector.shape_cast %6 : vector<16x128xf32> to vector<1x16x128xf32>
    %cst = arith.constant dense<0.000000e+00> : vector<16x128xf32>
    %9 = vector.multi_reduction <add>, %8, %cst [0] : vector<1x16x128xf32> to vector<16x128xf32>
    %10 = arith.addf %7, %9 : vector<16x128xf32>
    %c0_6 = arith.constant 0 : index
    %c0_7 = arith.constant 0 : index
    %11 = vector.load %arg3[%c0_6, %c0_7] : memref<16x128xf32, #tpu.memory_space<vmem>>, vector<16x128xf32>
    tpu.vector_store %arg3[%c0_6, %c0_7], %10 {strides = array<i32>} : memref<16x128xf32, #tpu.memory_space<vmem>>, vector<16x128xf32>,
    return
  }
  func.func @transform_0(%arg0: i32) -> (i32, i32) {
    %c0_i32 = arith.constant 0 : i32
    %c0_i32_0 = arith.constant 0 : i32
    return %arg0, %c0_i32 : i32, i32
  }
  func.func @transform_1(%arg0: i32) -> (i32, i32) {
    %c0_i32 = arith.constant 0 : i32
    %c0_i32_0 = arith.constant 0 : i32
    return %arg0, %c0_i32 : i32, i32
  }
  func.func @transform_2(%arg0: i32) -> (i32, i32) {
    %c0_i32 = arith.constant 0 : i32
    %c0_i32_0 = arith.constant 0 : i32
    %c0_i32_1 = arith.constant 0 : i32
    return %c0_i32, %c0_i32_0 : i32, i32
  }
}

</mosaic_0001>

<bundles_post_ra>
// kernel: tpu_custom_call.1
= control target key start
LH: loop header
LB: loop body
LE: loop exit
PB: predicated region body
PF: predicated region fallthrough
CT: control target
= control target key end

     0   :  { %7 = vsyncpa [#allocation3], 0  ;;  %s223_s0 = inlined_call_operand.hbm [shape: f32[16,128], index: 0, kind: input, shape index: {}]   ;;  %s224_s1 = inlined_call_operand.hbm [shape: f32[16,128], index: 1, kind: input, shape index: {}]   ;;  %s225_s2 = inlined_call_operand.hbm [shape: f32[16,128], index: 2, kind: output, shape index: {}]  }
   0x1   :  { %8 = vsyncpa [#allocation6], 0 }
   0x2   :  { %9 = vsyncpa [#allocation4], 0  ;;  %s158_s9 = smov [#allocation2]   ;;  %s86_s13 = scalar_lea.hbm %s223_s0, 256 }
   0x3   :  { %s15_s10 = sshll.u32 %s158_s9, 4  ;;  %p87_p0 = scmp.ne.s32.totalorder %s223_s0, %s86_s13  ;;  %s16_s10 = int_to_ptr.vmem [resolvable:$true] %s15_s10 }
   0x4   :  { %p90_p1 = scmp.lt.u32.totalorder %s86_s13, %s223_s0 }
   0x6   :  { %p92_p2 = pnand %p90_p1, %p87_p0 }
   0x8   :  { %95 = shalt.err (!%p92_p2)
}
   0x9   :  { %s96_s18 = scalar_lea.vmem %s16_s10, 256  ;;  %p101_p4 = scmp.lt.s32.totalorder %s16_s10, %s16_s10 }
   0xa   :  { %p97_p3 = scmp.ne.s32.totalorder %s16_s10, %s96_s18  ;;  %p102_p5 = scmp.lt.s32.totalorder %s96_s18, %s96_s18 }
   0xc   :  { %p103_p6 = por %p102_p5, %p101_p4 }
   0xe   :  { %p104_p7 = pnand %p103_p6, %p97_p3 }
  0x10   :  { %107 = shalt.err (!%p104_p7)
}
  0x11   :  { %s159_s19 = smov 128   ;;  %s160_s20 = smov 8  }
  0x12   :  { %21 = dma.hbm_to_vmem [thread:$0]  %s223_s0, 256, %s16_s10, [#allocation3], %s159_s19, %s159_s19, %s160_s20  }
  0x13   :  { %s161_s23 = smov [#allocation5]   ;;  %s108_s27 = scalar_lea.hbm %s224_s1, 256 }
  0x14   :  { %s27_s24 = sshll.u32 %s161_s23, 4  ;;  %p109_p8 = scmp.ne.s32.totalorder %s224_s1, %s108_s27  ;;  %s28_s24 = int_to_ptr.vmem [resolvable:$true] %s27_s24 }
  0x15   :  { %p112_p9 = scmp.lt.u32.totalorder %s108_s27, %s224_s1 }
  0x17   :  { %p114_p10 = pnand %p112_p9, %p109_p8 }
  0x19   :  { %117 = shalt.err (!%p114_p10)
}
  0x1a   :  { %s118_s4 = scalar_lea.vmem %s28_s24, 256  ;;  %p123_p12 = scmp.lt.s32.totalorder %s28_s24, %s28_s24 }
  0x1b   :  { %p119_p11 = scmp.ne.s32.totalorder %s28_s24, %s118_s4  ;;  %p124_p13 = scmp.lt.s32.totalorder %s118_s4, %s118_s4 }
  0x1d   :  { %p125_p0 = por %p124_p13, %p123_p12 }
  0x1f   :  { %p126_p1 = pnand %p125_p0, %p119_p11 }
  0x21   :  { %129 = shalt.err (!%p126_p1)
}
  0x22   :  { %33 = dma.hbm_to_vmem [thread:$0]  %s224_s1, 256, %s28_s24, [#allocation6], %s159_s19, %s159_s19, %s160_s20  }
  0x23   :  { %152 = dma.done.wait [#allocation3], 256  }
  0x24   :  { %153 = vsyncadd [#allocation3], 4294967040 }
  0x25   :  { %154 = dma.done.wait [#allocation6], 256  }
  0x26   :  { %155 = vsyncadd [#allocation6], 4294967040  ;;  %v46_v0 = vld [vmem:[#allocation2] sm:$0xff]  ;;  %v48_v1 = vld [vmem:[#allocation5] sm:$0xff]  ;;  %s162_s6 = smov [#allocation7]  }
  0x27   :  { %v47_v2 = vld [vmem:[#allocation2 + $0x8] sm:$0xff]  ;;  %v50_v3 = vsub.f32 %v46_v0, %v48_v1  ;;  %v49_v4 = vld [vmem:[#allocation5 + $0x8] sm:$0xff]  ;;  %s67_s7 = sshll.u32 %s162_s6, 4  ;;  %s68_s7 = int_to_ptr.vmem [resolvable:$true] %s67_s7 }
  0x28   :  { %v51_v5 = vsub.f32 %v47_v2, %v49_v4  ;;  %s130_s8 = scalar_lea.vmem %s68_s7, 256  ;;  %p135_p3 = scmp.lt.s32.totalorder %s68_s7, %s68_s7 }
  0x29   :  { %v52_v6 = vmul.f32 %v50_v3, %v50_v3  ;;  %p131_p2 = scmp.ne.s32.totalorder %s68_s7, %s130_s8  ;;  %p136_p4 = scmp.lt.s32.totalorder %s130_s8, %s130_s8 }
  0x2a   :  { %v53_v7 = vmul.f32 %v51_v5, %v51_v5 }
  0x2b   :  { %60 = vst [vmem:[#allocation7] sm:$0xff] %v52_v6  ;;  %p137_p5 = por %p136_p4, %p135_p3 }
  0x2c   :  { %61 = vst [vmem:[#allocation7 + $0x8] sm:$0xff] %v53_v7 }
  0x2d   :  { %p138_p6 = pnand %p137_p5, %p131_p2 }
  0x2f   :  { %141 = shalt.err (!%p138_p6)
}
  0x30   :  { %s142_s10 = scalar_lea.hbm %s225_s2, 256 }
  0x31   :  { %p143_p7 = scmp.ne.s32.totalorder %s225_s2, %s142_s10  ;;  %p146_p8 = scmp.lt.u32.totalorder %s142_s10, %s225_s2 }
  0x33   :  { %p148_p9 = pnand %p146_p8, %p143_p7 }
  0x35   :  { %151 = shalt.err (!%p148_p9)
}
  0x36   :  { %73 = dma.vmem_to_hbm [thread:$0]  %s68_s7, 256, %s225_s2, [#allocation4], %s159_s19, %s159_s19, %s160_s20  }
  0x37   :  { %156 = dma.done.wait [#allocation4], 256  }
  0x38   :  { %157 = vsyncadd [#allocation4], 4294967040 }
  0x39   :  { %77 = vsyncpa [#allocation3], 1 }
  0x3a   :  { %78 = vsyncpa [#allocation6], 1 }
  0x3b   :  { %79 = vsyncpa [#allocation4], 1 }

</bundles_post_ra>
